<compile_context>
chip_gen: v7x
topology: tpu7x:2x2x1
jax: 0.10.0
libtpu: 0.0.40
codegen_flags: <defaults>
</compile_context>

<pallas_src>
import functools

import jax
import jax.numpy as jnp
from jax import lax
from jax.experimental import pallas as pl
from jax.experimental.pallas import tpu as pltpu


def _loss_kernel(margin, inv_b,
                 pred_re_ref, pred_im_ref, tgt_re_ref, tgt_im_ref,
                 samp_re_ref, samp_im_ref, out_ref):
    pred_re = pred_re_ref[...]                                 # [B, D]
    pred_im = pred_im_ref[...]                                 # [B, D]
    tgt_re = tgt_re_ref[...]                                   # [B, D]
    tgt_im = tgt_im_ref[...]                                   # [B, D]
    samp_re = samp_re_ref[...]                                 # [S, D]
    samp_im = samp_im_ref[...]                                 # [S, D]
    d = samp_re_ref.shape[1]

    # ---- MSE: sum over feature dim of squared complex magnitude, mean over batch
    diff_re = pred_re - tgt_re
    diff_im = pred_im - tgt_im
    row_sq = jnp.sum(diff_re * diff_re + diff_im * diff_im,
                     axis=1, keepdims=True)                    # [B, 1]
    mse = jnp.sum(row_sq, axis=0, keepdims=True) * inv_b       # [1, 1]

    # ---- paired l2 distance between predicts and targets
    pos_dist = jnp.sqrt(row_sq)                                # [B, 1]

    # ---- pairwise squared l2 distances targets vs sampled word vecs (MXU form):
    #   d2[b,s] = ||tgt[b]||^2 + ||samp[s]||^2 - 2 * Re(<tgt[b], conj(samp[s])>)
    # with the complex inner product split into two real matmuls.
    dn = (((1,), (1,)), ((), ()))                              # contract dim 1 of both (A @ B.T)
    cross = (lax.dot_general(tgt_re, samp_re, dn,
                             preferred_element_type=jnp.float32)
             + lax.dot_general(tgt_im, samp_im, dn,
                               preferred_element_type=jnp.float32))        # [B, S]

    tgt_n2 = jnp.sum(tgt_re * tgt_re + tgt_im * tgt_im,
                     axis=1, keepdims=True)                    # [B, 1]
    samp_sq = samp_re * samp_re + samp_im * samp_im            # [S, D]
    # Row-vector of per-sample norms via a ones(1,D) matmul -> [1, S]
    # (no in-kernel transpose needed; stays on the MXU).
    samp_n2 = lax.dot_general(jnp.ones((1, d), jnp.float32), samp_sq, dn,
                              preferred_element_type=jnp.float32)          # [1, S]

    d2 = jnp.maximum(tgt_n2 + samp_n2 - 2.0 * cross, 0.0)      # [B, S], clamp cancellation
    neg_dist = jnp.sqrt(jnp.min(d2, axis=1, keepdims=True))    # [B, 1]

    trip_rows = jnp.maximum(pos_dist - neg_dist + margin, 0.0) # [B, 1]
    trip = jnp.sum(trip_rows, axis=0, keepdims=True) * inv_b   # [1, 1]

    out_ref[...] = jnp.concatenate([trip, mse], axis=1)        # [1, 2]


def complex_mse_triplet_loss(pred_re, pred_im, tgt_re, tgt_im,
                             samp_re, samp_im, *, margin=5.0):
    B = pred_re.shape[0]

    # margin / 1/B are Python floats -> trace-time literals (no captured consts).
    kernel = functools.partial(_loss_kernel, float(margin), 1.0 / float(B))

    args = [x.astype(jnp.float32)
            for x in (pred_re, pred_im, tgt_re, tgt_im, samp_re, samp_im)]

    out = pl.pallas_call(
        kernel,
        in_specs=[pl.BlockSpec(memory_space=pltpu.MemorySpace.VMEM)] * 6,
        out_specs=pl.BlockSpec(memory_space=pltpu.MemorySpace.VMEM),
        out_shape=jax.ShapeDtypeStruct((1, 2), jnp.float32),
    )(*args)

    return {"triplet_loss": out[0, 0], "mse": out[0, 1]}


def reference(pred, tgt, samp, margin=5.0):
    diffs = pred - tgt
    sq = diffs.real ** 2 + diffs.imag ** 2
    mse = jnp.sum(sq, axis=1).mean()
    pos = jnp.sqrt(jnp.sum(jnp.abs(pred - tgt) ** 2, axis=1))
    d2 = jnp.sum(jnp.abs(tgt[:, None, :] - samp[None, :, :]) ** 2, axis=-1)
    neg = jnp.sqrt(jnp.min(d2, axis=1))
    trip = jnp.maximum(pos - neg + margin, 0.0).mean()
    return {"triplet_loss": trip, "mse": mse}


if __name__ == "__main__":
    key = jax.random.PRNGKey(0)
    B, D = 8, 64            # batch, (complex) embedding dim
    V, S = 50, 10           # vocab size, sampling_word_size (module default)
    margin = 5.0

    k1, k2, k3, k4, k5, k6, k7 = jax.random.split(key, 7)
    pred_re = jax.random.normal(k1, (B, D), jnp.float32)
    pred_im = jax.random.normal(k2, (B, D), jnp.float32)
    tgt_re = jax.random.normal(k3, (B, D), jnp.float32)
    tgt_im = jax.random.normal(k4, (B, D), jnp.float32)
    # deterministic "model.predictor.all_word_embeddings()" (synthetic weights)
    emb_re = jax.random.normal(k5, (V, D), jnp.float32)
    emb_im = jax.random.normal(k6, (V, D), jnp.float32)

    # TODO(synk): np.random.choice vocab sampling + embedding row-gather stays in
    # plain JAX (negligible at S=10); could be fused via PrefetchScalarGridSpec.
    sample_idx = jax.random.randint(k7, (S,), 0, V)
    samp_re = emb_re[sample_idx]
    samp_im = emb_im[sample_idx]

    out = complex_mse_triplet_loss(pred_re, pred_im, tgt_re, tgt_im,
                                   samp_re, samp_im, margin=margin)
    jax.block_until_ready(out)

    # sanity check against a pure-JAX complex reference
    ref = reference(pred_re + 1j * pred_im, tgt_re + 1j * tgt_im,
                    samp_re + 1j * samp_im, margin)
    assert abs(float(out["mse"]) - float(ref["mse"])) < 1e-3
    assert abs(float(out["triplet_loss"]) - float(ref["triplet_loss"])) < 1e-3

    print("KERNEL_OK")
</pallas_src>

<mosaic_0001>
module attributes {stable_mosaic.version = 11 : i64} {
  func.func @_loss_kernel(%arg0: memref<8x64xf32, #tpu.memory_space<vmem>>, %arg1: memref<8x64xf32, #tpu.memory_space<vmem>>, %arg2: memref<8x64xf32, #tpu.memory_space<vmem>>, %arg3: memref<8x64xf32, #tpu.memory_space<vmem>>, %arg4: memref<10x64xf32, #tpu.memory_space<vmem>>, %arg5: memref<10x64xf32, #tpu.memory_space<vmem>>, %arg6: memref<1x2xf32, #tpu.memory_space<vmem>>) attributes {dimension_semantics = [], scalar_prefetch = 0 : i64, scratch_operands = 0 : i64, tpu.core_type = #tpu.core_type<tc>} {
    %c0 = arith.constant 0 : index
    %c0_0 = arith.constant 0 : index
    %0 = vector.load %arg0[%c0, %c0_0] : memref<8x64xf32, #tpu.memory_space<vmem>>, vector<8x64xf32>
    %c0_1 = arith.constant 0 : index
    %c0_2 = arith.constant 0 : index
    %1 = vector.load %arg1[%c0_1, %c0_2] : memref<8x64xf32, #tpu.memory_space<vmem>>, vector<8x64xf32>
    %c0_3 = arith.constant 0 : index
    %c0_4 = arith.constant 0 : index
    %2 = vector.load %arg2[%c0_3, %c0_4] : memref<8x64xf32, #tpu.memory_space<vmem>>, vector<8x64xf32>
    %c0_5 = arith.constant 0 : index
    %c0_6 = arith.constant 0 : index
    %3 = vector.load %arg3[%c0_5, %c0_6] : memref<8x64xf32, #tpu.memory_space<vmem>>, vector<8x64xf32>
    %c0_7 = arith.constant 0 : index
    %c0_8 = arith.constant 0 : index
    %4 = vector.load %arg4[%c0_7, %c0_8] : memref<10x64xf32, #tpu.memory_space<vmem>>, vector<10x64xf32>
    %c0_9 = arith.constant 0 : index
    %c0_10 = arith.constant 0 : index
    %5 = vector.load %arg5[%c0_9, %c0_10] : memref<10x64xf32, #tpu.memory_space<vmem>>, vector<10x64xf32>
    %6 = arith.subf %0, %2 : vector<8x64xf32>
    %7 = arith.subf %1, %3 : vector<8x64xf32>
    %8 = arith.mulf %6, %6 : vector<8x64xf32>
    %9 = arith.mulf %7, %7 : vector<8x64xf32>
    %10 = arith.addf %8, %9 : vector<8x64xf32>
    %cst = arith.constant dense<0.000000e+00> : vector<8xf32>
    %11 = vector.multi_reduction <add>, %10, %cst [1] : vector<8x64xf32> to vector<8xf32>
    %12 = vector.shape_cast %11 : vector<8xf32> to vector<8x1xf32>
    %cst_11 = arith.constant dense<0.000000e+00> : vector<1xf32>
    %13 = vector.multi_reduction <add>, %12, %cst_11 [0] : vector<8x1xf32> to vector<1xf32>
    %14 = vector.shape_cast %13 : vector<1xf32> to vector<1x1xf32>
    %cst_12 = arith.constant 1.250000e-01 : f32
    %15 = vector.broadcast %cst_12 : f32 to vector<1x1xf32>
    %16 = arith.mulf %14, %15 : vector<1x1xf32>
    %17 = math.sqrt %12 : vector<8x1xf32>
    %cst_13 = arith.constant dense<0.000000e+00> : vector<8x10xf32>
    %18 = tpu.matmul %2, %4, %cst_13 {dimension_numbers = #tpu.dot_dimension_numbers<[1], [1], [0], [0], [0, 0, 1, 0], [], []>} : vector<8x64xf32>, vector<10x64xf32>, vector<8x10xf32> -> vector<8x10xf32>
    %cst_14 = arith.constant dense<0.000000e+00> : vector<8x10xf32>
    %19 = tpu.matmul %3, %5, %cst_14 {dimension_numbers = #tpu.dot_dimension_numbers<[1], [1], [0], [0], [0, 0, 1, 0], [], []>} : vector<8x64xf32>, vector<10x64xf32>, vector<8x10xf32> -> vector<8x10xf32>
    %20 = arith.addf %18, %19 : vector<8x10xf32>
    %21 = arith.mulf %2, %2 : vector<8x64xf32>
    %22 = arith.mulf %3, %3 : vector<8x64xf32>
    %23 = arith.addf %21, %22 : vector<8x64xf32>
    %cst_15 = arith.constant dense<0.000000e+00> : vector<8xf32>
    %24 = vector.multi_reduction <add>, %23, %cst_15 [1] : vector<8x64xf32> to vector<8xf32>
    %25 = vector.shape_cast %24 : vector<8xf32> to vector<8x1xf32>
    %26 = arith.mulf %4, %4 : vector<10x64xf32>
    %27 = arith.mulf %5, %5 : vector<10x64xf32>
    %28 = arith.addf %26, %27 : vector<10x64xf32>
    %cst_16 = arith.constant 1.000000e+00 : f32
    %29 = vector.broadcast %cst_16 : f32 to vector<1x64xf32>
    %cst_17 = arith.constant dense<0.000000e+00> : vector<1x10xf32>
    %30 = tpu.matmul %29, %28, %cst_17 {dimension_numbers = #tpu.dot_dimension_numbers<[1], [1], [0], [0], [0, 0, 1, 0], [], []>} : vector<1x64xf32>, vector<10x64xf32>, vector<1x10xf32> -> vector<1x10xf32>
    %31 = vector.broadcast %25 : vector<8x1xf32> to vector<8x10xf32>
    %32 = vector.broadcast %30 : vector<1x10xf32> to vector<8x10xf32>
    %33 = arith.addf %31, %32 : vector<8x10xf32>
    %cst_18 = arith.constant 2.000000e+00 : f32
    %34 = vector.broadcast %cst_18 : f32 to vector<8x10xf32>
    %35 = arith.mulf %34, %20 : vector<8x10xf32>
    %36 = arith.subf %33, %35 : vector<8x10xf32>
    %cst_19 = arith.constant 0.000000e+00 : f32
    %37 = vector.broadcast %cst_19 : f32 to vector<8x10xf32>
    %38 = arith.maximumf %36, %37 : vector<8x10xf32>
    %cst_20 = arith.constant dense<0x7F800000> : vector<8xf32>
    %39 = vector.multi_reduction <minimumf>, %38, %cst_20 [1] : vector<8x10xf32> to vector<8xf32>
    %40 = vector.shape_cast %39 : vector<8xf32> to vector<8x1xf32>
    %41 = math.sqrt %40 : vector<8x1xf32>
    %42 = arith.subf %17, %41 : vector<8x1xf32>
    %cst_21 = arith.constant 5.000000e+00 : f32
    %43 = vector.broadcast %cst_21 : f32 to vector<8x1xf32>
    %44 = arith.addf %42, %43 : vector<8x1xf32>
    %cst_22 = arith.constant 0.000000e+00 : f32
    %45 = vector.broadcast %cst_22 : f32 to vector<8x1xf32>
    %46 = arith.maximumf %44, %45 : vector<8x1xf32>
    %cst_23 = arith.constant dense<0.000000e+00> : vector<1xf32>
    %47 = vector.multi_reduction <add>, %46, %cst_23 [0] : vector<8x1xf32> to vector<1xf32>
    %48 = vector.shape_cast %47 : vector<1xf32> to vector<1x1xf32>
    %cst_24 = arith.constant 1.250000e-01 : f32
    %49 = vector.broadcast %cst_24 : f32 to vector<1x1xf32>
    %50 = arith.mulf %48, %49 : vector<1x1xf32>
    %51 = tpu.concatenate %50, %16 in 1 : vector<1x1xf32>, vector<1x1xf32> -> vector<1x2xf32>
    %c0_25 = arith.constant 0 : index
    %c0_26 = arith.constant 0 : index
    %52 = vector.load %arg6[%c0_25, %c0_26] : memref<1x2xf32, #tpu.memory_space<vmem>>, vector<1x2xf32>
    tpu.vector_store %arg6[%c0_25, %c0_26], %51 {strides = array<i32>} : memref<1x2xf32, #tpu.memory_space<vmem>>, vector<1x2xf32>,
    return
  }
}

</mosaic_0001>

<bundles_post_ra>
// kernel: tpu_custom_call.1
= control target key start
LH: loop header
LB: loop body
LE: loop exit
PB: predicated region body
PF: predicated region fallthrough
CT: control target
= control target key end

     0   :  { %11 = vsyncpa [#allocation3], 0  ;;  %s768_s0 = inlined_call_operand.hbm [shape: f32[8,64], index: 0, kind: input, shape index: {}]   ;;  %s769_s1 = inlined_call_operand.hbm [shape: f32[8,64], index: 1, kind: input, shape index: {}]   ;;  %s770_s2 = inlined_call_operand.hbm [shape: f32[8,64], index: 2, kind: input, shape index: {}]   ;;  %s771_s3 = inlined_call_operand.hbm [shape: f32[8,64], index: 3, kind: input, shape index: {}]   ;;  %s772_s4 = inlined_call_operand.hbm [shape: f32[10,64], index: 4, kind: input, shape index: {}]   ;;  %s773_s5 = inlined_call_operand.vmem [shape: f32[10,64], index: 5, kind: input, shape index: {}]   ;;  %s774_s6 = inlined_call_operand.hbm [shape: f32[1,2], index: 6, kind: output, shape index: {}]  }
   0x1   :  { %12 = vsyncpa [#allocation6], 0 }
   0x2   :  { %13 = vsyncpa [#allocation9], 0 }
   0x3   :  { %14 = vsyncpa [#allocation4], 0  ;;  %s623_s21 = smov [#allocation5]   ;;  %s624_s23 = smov [#allocation8]  }
   0x4   :  { %s31_s22 = sshll.u32 %s623_s21, 4  ;;  %s51_s24 = sshll.u32 %s624_s23, 4  ;;  %s32_s22 = int_to_ptr.vmem [resolvable:$true] %s31_s22  ;;  %s52_s24 = int_to_ptr.vmem [resolvable:$true] %s51_s24 }
   0x5   :  { %s483_s27 = scalar_lea.hbm %s769_s1, 128 }
   0x6   :  { %p484_p0 = scmp.ne.s32.totalorder %s769_s1, %s483_s27  ;;  %p487_p1 = scmp.lt.u32.totalorder %s483_s27, %s769_s1 }
   0x8   :  { %p489_p2 = pnand %p487_p1, %p484_p0 }
   0xa   :  { %492 = shalt.err (!%p489_p2)
}
   0xb   :  { %s493_s8 = scalar_lea.vmem %s32_s22, 128  ;;  %p498_p4 = scmp.lt.s32.totalorder %s32_s22, %s32_s22 }
   0xc   :  { %p494_p3 = scmp.ne.s32.totalorder %s32_s22, %s493_s8  ;;  %p499_p5 = scmp.lt.s32.totalorder %s493_s8, %s493_s8 }
   0xe   :  { %p500_p6 = por %p499_p5, %p498_p4 }
  0x10   :  { %p501_p7 = pnand %p500_p6, %p494_p3 }
  0x12   :  { %504 = shalt.err (!%p501_p7)
}
  0x13   :  { %34 = dma.hbm_to_vmem [thread:$0]  %s769_s1, 128, %s32_s22, [#allocation6]  }
  0x14   :  { %s505_s13 = scalar_lea.hbm %s771_s3, 128 }
  0x15   :  { %p506_p8 = scmp.ne.s32.totalorder %s771_s3, %s505_s13  ;;  %p509_p9 = scmp.lt.u32.totalorder %s505_s13, %s771_s3 }
  0x17   :  { %p511_p10 = pnand %p509_p9, %p506_p8 }
  0x19   :  { %514 = shalt.err (!%p511_p10)
}
  0x1a   :  { %s515_s18 = scalar_lea.vmem %s52_s24, 128  ;;  %p520_p12 = scmp.lt.s32.totalorder %s52_s24, %s52_s24 }
  0x1b   :  { %p516_p11 = scmp.ne.s32.totalorder %s52_s24, %s515_s18  ;;  %p521_p13 = scmp.lt.s32.totalorder %s515_s18, %s515_s18 }
  0x1d   :  { %p522_p0 = por %p521_p13, %p520_p12 }
  0x1f   :  { %p523_p1 = pnand %p522_p0, %p516_p11 }
  0x21   :  { %526 = shalt.err (!%p523_p1)
}
  0x22   :  { %54 = dma.hbm_to_vmem [thread:$0]  %s771_s3, 128, %s52_s24, [#allocation9]  }
  0x23   :  { %s625_s20 = smov [#allocation2]   ;;  %s626_s22 = smov [#allocation7]  }
  0x24   :  { %s21_s21 = sshll.u32 %s625_s20, 4  ;;  %s41_s23 = sshll.u32 %s626_s22, 4  ;;  %s22_s21 = int_to_ptr.vmem [resolvable:$true] %s21_s21  ;;  %s42_s23 = int_to_ptr.vmem [resolvable:$true] %s41_s23 }
  0x25   :  { %s527_s27 = scalar_lea.hbm %s768_s0, 128 }
  0x26   :  { %p528_p2 = scmp.ne.s32.totalorder %s768_s0, %s527_s27  ;;  %p531_p3 = scmp.lt.u32.totalorder %s527_s27, %s768_s0 }
  0x28   :  { %p533_p4 = pnand %p531_p3, %p528_p2 }
  0x2a   :  { %536 = shalt.err (!%p533_p4)
}
  0x2b   :  { %s537_s3 = scalar_lea.vmem %s22_s21, 128  ;;  %p542_p6 = scmp.lt.s32.totalorder %s22_s21, %s22_s21 }
  0x2c   :  { %p538_p5 = scmp.ne.s32.totalorder %s22_s21, %s537_s3  ;;  %p543_p7 = scmp.lt.s32.totalorder %s537_s3, %s537_s3 }
  0x2e   :  { %p544_p8 = por %p543_p7, %p542_p6 }
  0x30   :  { %p545_p9 = pnand %p544_p8, %p538_p5 }
  0x32   :  { %548 = shalt.err (!%p545_p9)
}
  0x33   :  { %24 = dma.hbm_to_vmem [thread:$0]  %s768_s0, 128, %s22_s21, [#allocation3]  }
  0x34   :  { %s549_s11 = scalar_lea.hbm %s770_s2, 128 }
  0x35   :  { %p550_p10 = scmp.ne.s32.totalorder %s770_s2, %s549_s11  ;;  %p553_p11 = scmp.lt.u32.totalorder %s549_s11, %s770_s2 }
  0x37   :  { %p555_p12 = pnand %p553_p11, %p550_p10 }
  0x39   :  { %558 = shalt.err (!%p555_p12)
}
  0x3a   :  { %s559_s16 = scalar_lea.vmem %s42_s23, 128  ;;  %p564_p0 = scmp.lt.s32.totalorder %s42_s23, %s42_s23 }
  0x3b   :  { %p560_p13 = scmp.ne.s32.totalorder %s42_s23, %s559_s16  ;;  %p565_p1 = scmp.lt.s32.totalorder %s559_s16, %s559_s16 }
  0x3d   :  { %p566_p2 = por %p565_p1, %p564_p0 }
  0x3f   :  { %p567_p3 = pnand %p566_p2, %p560_p13 }
  0x41   :  { %570 = shalt.err (!%p567_p3)
}
  0x42   :  { %44 = dma.hbm_to_vmem [thread:$0]  %s770_s2, 128, %s42_s23, [#allocation6]  }
  0x43   :  { %s627_s18 = smov [#allocation10]   ;;  %s571_s21 = scalar_lea.hbm %s772_s4, 256 }
  0x44   :  { %s60_s1 = sshll.u32 %s627_s18, 4  ;;  %p572_p4 = scmp.ne.s32.totalorder %s772_s4, %s571_s21  ;;  %s61_s1 = int_to_ptr.vmem [resolvable:$true] %s60_s1 }
  0x45   :  { %p575_p5 = scmp.lt.u32.totalorder %s571_s21, %s772_s4 }
  0x47   :  { %p577_p6 = pnand %p575_p5, %p572_p4 }
  0x49   :  { %580 = shalt.err (!%p577_p6)
}
  0x4a   :  { %s581_s28 = scalar_lea.vmem %s61_s1, 256  ;;  %p586_p8 = scmp.lt.s32.totalorder %s61_s1, %s61_s1 }
  0x4b   :  { %p582_p7 = scmp.ne.s32.totalorder %s61_s1, %s581_s28  ;;  %p587_p9 = scmp.lt.s32.totalorder %s581_s28, %s581_s28 }
  0x4d   :  { %p588_p10 = por %p587_p9, %p586_p8 }
  0x4f   :  { %p589_p11 = pnand %p588_p10, %p582_p7 }
  0x51   :  { %592 = shalt.err (!%p589_p11)
}
  0x52   :  { %s628_s2 = smov 128   ;;  %s629_s23 = smov 8  }
  0x53   :  { %66 = dma.hbm_to_vmem [thread:$0]  %s772_s4, 256, %s61_s1, [#allocation9], %s628_s2, %s628_s2, %s629_s23  }
  0x54   :  { %615 = dma.done.wait [#allocation3], 128  }
  0x55   :  { %616 = vsyncadd [#allocation3], 4294967168 }
  0x56   :  { %617 = dma.done.wait [#allocation6], 256  }
  0x57   :  { %618 = vsyncadd [#allocation6], 4294967040 }
  0x58   :  { %619 = dma.done.wait [#allocation9], 384  }
  0x59   :  { %620 = vsyncadd [#allocation9], 4294966912  ;;  %v630_v0 = vmov 0.0|0.0   ;;  %vm631_vm0 = vmmov 0   ;;  %v632_v1 = vmov 0.0   ;;  %vm97_vm1 = vcmask 523264  }
  0x5a   :  { %453 = vmatprep.subr.bf16.mxu0 %v630_v0  ;;  %461 = vmatprep.subr.bf16.mxu1 %v630_v0  ;;  %vm734_vm2 = vmpackc.low %vm97_vm1, %vm97_vm1  ;;  %v90_v3 = vld [vmem:[%s773_s5] sm:$0xff]  ;;  %v91_v4 = vld [vmem:[%s773_s5 + $0x8] sm:$0x3]  ;;  %v633_v30 = vmov 1.0   ;;  %v364_v31 = vlaneseq  ;;  %vm372_vm3 = vcmask 80896   ;;  %s634_s5 = smov [#allocation11]  }
  0x5b   :  { %436 = vmatprep.mubr.msk.f32.mxu0 %vm631_vm0, %v632_v1  ;;  %450 = vmatprep.mubr.msk.f32.mxu1 %vm631_vm0, %v632_v1  ;;  %v88_v5 = vld [vmem:[#allocation10] sm:$0xff]  ;;  %v454_v6 = vpack.c.bf16 %v91_v4, %v90_v3  ;;  %v281_v7 = vmul.f32 %v90_v3, %v90_v3  ;;  %v282_v8 = vmul.f32 %v91_v4, %v91_v4  ;;  %v89_v9 = vld [vmem:[#allocation10 + $0x8] sm:$0x3]  ;;  %v87_v11 = vld [vmem:[#allocation8] sm:$0xff]  ;;  %s403_s8 = sshll.u32 %s634_s5, 4  ;;  %vm393_vm8 = vcmask 7168   ;;  %s404_s8 = int_to_ptr.vmem [resolvable:$true] %s403_s8 }
  0x5c   :  { %v279_v10 = vmul.f32 %v88_v5, %v88_v5  ;;  %v86_v12 = vld [vmem:[#allocation7] sm:$0xff]  ;;  %v280_v13 = vmul.f32 %v89_v9, %v89_v9  ;;  %v274_v15 = vmul.f32 %v87_v11, %v87_v11  ;;  %v84_v16 = vld [vmem:[#allocation2] sm:$0xff]  ;;  %v85_v17 = vld [vmem:[#allocation5] sm:$0xff]  ;;  %v458_v27 = vpack.c.bf16 %v89_v9, %v88_v5  ;;  %s593_s9 = scalar_lea.vmem %s404_s8, 16  ;;  %s597_s10 = scalar_lea.vmem %s404_s8, 32 }
  0x5d   :  { %v273_v14 = vmul.f32 %v86_v12, %v86_v12  ;;  %456 = vmatpush3.bf16.xpose.msk.msra.mxu0 %vm734_vm2, %v454_v6  ;;  %v92_v19 = vsub.f32 %v84_v16, %v86_v12  ;;  %v93_v20 = vsub.f32 %v85_v17, %v87_v11  ;;  %v365_v32 = vshrl.u32 %v364_v31, 7  ;;  %p594_p12 = scmp.ne.s32.totalorder %s404_s8, %s593_s9  ;;  %p598_p13 = scmp.lt.s32.totalorder %s404_s8, %s404_s8 }
  0x5e   :  { %v283_v18 = vadd.f32 %v281_v7, %v279_v10  ;;  %v284_v21 = vadd.f32 %v282_v8, %v280_v13  ;;  %457 = vmatprep.subr.bf16.mxu0 %v630_v0  ;;  %vm395_vm9 = vcmask 8192   ;;  %p599_p0 = scmp.lt.s32.totalorder %s597_s10, %s593_s9 }
  0x5f   :  { %v275_v22 = vadd.f32 %v274_v15, %v273_v14  ;;  %v94_v23 = vmul.f32 %v92_v19, %v92_v19  ;;  %v95_v24 = vmul.f32 %v93_v20, %v93_v20  ;;  %v366_v33 = vsub.s32 0, %v365_v32 }
  0x60   :  { %v462_v25 = vpack.c.bf16 %v284_v21, %v283_v18  ;;  %p600_p1 = por %p599_p0, %p598_p13 }
  0x61   :  { %v276_v26 = vsel %vm97_vm1, %v275_v22, 0.0  ;;  %v96_v28 = vadd.f32 %v95_v24, %v94_v23 }
  0x62   :  { %277 = vadd.xlane.f32.xlu0 %v276_v26  ;;  %464 = vmatpush3.bf16.xpose.msk.msra.mxu1 %vm734_vm2, %v462_v25  ;;  %p601_p2 = pnand %p600_p1, %p594_p12 }
  0x63   :  { %v98_v29 = vsel %vm97_vm1, %v96_v28, 0.0 }
  0x64   :  { %437 = vmatmul.mubr.msk.f32.vlgmr.msra.gmra.mrb[0].mxu0 %vm97_vm1, %v87_v11 }
  0x65   :  { %460 = vmatpush3.bf16.xpose.msk.msra.mxu0 %vm734_vm2, %v458_v27  ;;  %443 = vmatprep.mubr.msk.f32.mxu0 %vm631_vm0, %v632_v1 }
  0x66   :  { %99 = vadd.xlane.f32.xlu0 %v98_v29 }
  0x69   :  { %451 = vmatmul.mubr.msk.f32.vlgmr.msra.gmra.mrb[0].mxu1 %vm97_vm1, %v633_v30 }
  0x6c   :  { %444 = vmatmul.mubr.msk.f32.vlgmr.msra.gmra.mrb[0].mxu0 %vm97_vm1, %v86_v12 }
  0xef   :  { %v278_v35 = vpop.xlane.xlu0 %277 }
  0xf3   :  { %v100_v45 = vpop.xlane.xlu0 %99 }
  0xf4   :  { %479 = vrsqrt.f32 %v100_v45  ;;  %vm110_vm4 = vcmp.eq.f32.partialorder %v100_v45, inf  ;;  %v101_v49 = vrot.slane %v100_v45, 4  ;;  %v113_v51 = vand.u32 2147483648, %v100_v45 }
  0xf5   :  { %vm112_vm5 = vcmp.eq.f32.partialorder %v100_v45, 0.0 }
  0xf6   :  { %v102_v56 = vadd.f32 %v101_v49, %v100_v45 }
  0xf8   :  { %v103_v61 = vrot.slane %v102_v56, 2 }
  0xfa   :  { %v104_v0 = vadd.f32 %v103_v61, %v102_v56 }
  0xfc   :  { %v105_v2 = vrot.slane %v104_v0, 1 }
  0xfe   :  { %v480_v47 = vpop.eup %479  ;;  %v106_v5 = vadd.f32 %v105_v2, %v104_v0 }
  0xff   :  { %v109_v48 = vmul.f32 %v480_v47, %v100_v45 }
 0x100   :  { %v107_v8 = vmul.f32 0.125, %v106_v5 }
 0x101   :  { %v111_v52 = vsel %vm110_vm4, %v100_v45, %v109_v48 }
 0x102   :  { %v114_v57 = vsel %vm112_vm5, %v113_v51, %v111_v52 }
 0x13c   :  { %v360_v34 = vpop.f32.mrb[0].mxu1 }
 0x13d   :  { %v367_v36 = vrot.slane %v360_v34, %v366_v33  ;;  %v452_v37 = vpop.f32.mrb[1].mxu1 }
 0x13f   :  { %v368_v38 = vadd.f32 %v367_v36, %v278_v35  ;;  %v269_v39 = vpop.f32.mrb[0].mxu0 }
 0x140   :  { %v369_v40 = vmul.f32 2.0, %v269_v39  ;;  %v445_v41 = vpop.f32.mrb[1].mxu0 }
 0x142   :  { %v370_v42 = vsub.f32 %v368_v38, %v369_v40 }
 0x144   :  { %v371_v43 = vmax.f32 %v370_v42, 0.0 }
 0x146   :  { %v373_v44 = vsel %vm372_vm3, %v371_v43, inf }
 0x147   :  { %374 = vmin.xlane.f32.xlu1 %v373_v44 }
 0x1d4   :  { %v375_v46 = vpop.xlane.xlu1 %374 }
 0x1d5   :  { %481 = vrsqrt.f32 %v375_v46  ;;  %vm378_vm6 = vcmp.eq.f32.partialorder %v375_v46, inf  ;;  %v381_v54 = vand.u32 2147483648, %v375_v46  ;;  %vm380_vm7 = vcmp.eq.f32.partialorder %v375_v46, 0.0 }
 0x1df   :  { %v482_v50 = vpop.eup %481 }
 0x1e0   :  { %v377_v53 = vmul.f32 %v482_v50, %v375_v46 }
 0x1e2   :  { %v379_v55 = vsel %vm378_vm6, %v375_v46, %v377_v53 }
 0x1e3   :  { %v382_v58 = vsel %vm380_vm7, %v381_v54, %v379_v55 }
 0x1e4   :  { %v383_v59 = vsub.f32 %v114_v57, %v382_v58 }
 0x1e6   :  { %v384_v60 = vadd.f32 5.0, %v383_v59 }
 0x1e8   :  { %v385_v62 = vmax.f32 %v384_v60, 0.0 }
 0x1ea   :  { %v386_v63 = vrot.slane %v385_v62, 4 }
 0x1ec   :  { %v387_v1 = vadd.f32 %v386_v63, %v385_v62 }
 0x1ee   :  { %v388_v3 = vrot.slane %v387_v1, 2 }
 0x1f0   :  { %v389_v4 = vadd.f32 %v388_v3, %v387_v1 }
 0x1f2   :  { %v390_v6 = vrot.slane %v389_v4, 1 }
 0x1f4   :  { %v391_v7 = vadd.f32 %v390_v6, %v389_v4 }
 0x1f6   :  { %v392_v9 = vmul.f32 0.125, %v391_v7 }
 0x1f8   :  { %v394_v10 = vsel %vm393_vm8, %v392_v9, %v107_v8 }
 0x1f9   :  { %396 = vst.msk [vmem:[#allocation11] sm:$0x1] %vm395_vm9, %v394_v10 }
 0x1fa   :  { %604 = shalt.err (!%p601_p2)
}
 0x1fb   :  { %s605_s13 = scalar_lea.hbm %s774_s6, 16 }
 0x1fc   :  { %p606_p3 = scmp.ne.s32.totalorder %s774_s6, %s605_s13  ;;  %p609_p4 = scmp.lt.u32.totalorder %s605_s13, %s774_s6 }
 0x1fe   :  { %p611_p5 = pnand %p609_p4, %p606_p3 }
 0x200   :  { %614 = shalt.err (!%p611_p5)
}
 0x201   :  { %406 = dma.vmem_to_hbm [thread:$0]  %s404_s8, 16, %s774_s6, [#allocation4]  }
 0x202   :  { %621 = dma.done.wait [#allocation4], 16  }
 0x203   :  { %622 = vsyncadd [#allocation4], 4294967280 }
 0x204   :  { %410 = vsyncpa [#allocation3], 1 }
 0x205   :  { %411 = vsyncpa [#allocation6], 1 }
 0x206   :  { %412 = vsyncpa [#allocation9], 1 }
 0x207   :  { %413 = vsyncpa [#allocation4], 1 }

</bundles_post_ra>
